<compile_context>
chip_gen: v7x
topology: tpu7x:2x2x1
jax: 0.10.0
libtpu: 0.0.40
codegen_flags: <defaults>
</compile_context>

<pallas_src>
import math
import jax
import jax.numpy as jnp
from jax.experimental import pallas as pl
from jax.experimental.pallas import tpu as pltpu

NUM_NEURON = 20          # hidden width (num_neuron * ratio, ratio=1.0)
IN_FEATURES = 784        # 1*28*28
OUT_FEATURES = 10
SPARSITY = 0.5           # parser_args.sparsity (fraction of weights kept)
USE_BIAS = True          # parser_args.bias

# f32 x tile: 4096*784*4 B ~= 12.25 MiB per buffer, x2 pipeline buffers ~24.5 MiB.
MAX_BATCH_TILE = 4096
VMEM_LIMIT_BYTES = 40 * 1024 * 1024   # > v5e's 16 MiB default, < v7x's 64 MiB physical


def net1_kernel(x_ref, w1_ref, b1_ref, w2_ref, b2_ref, out_ref):
    """Forward for one batch tile.

    x_ref  : (Bt, 784)  f32 (cast to bf16 in-kernel)   w1_ref : (784, 20) bf16
    b1_ref : (1, 20)    f32                             w2_ref : (20, 10)  f32
    b2_ref : (1, 10)    f32                             out_ref: (Bt, 10)  f32
    """
    # fc1 on the MXU: in-kernel bf16 cast (free VPU op, kernel is DMA-bound),
    # f32 accumulation via preferred_element_type.
    x_bf16 = x_ref[...].astype(jnp.bfloat16)
    h = jnp.dot(x_bf16, w1_ref[...], preferred_element_type=jnp.float32)
    h = jnp.maximum(h + b1_ref[...], 0.0)

    # fc2 (tiny, f32) + bias.
    logits = jnp.dot(h, w2_ref[...], preferred_element_type=jnp.float32)
    logits = logits + b2_ref[...]

    # log_softmax over dim=1 (lane axis), f32 throughout.  Row-independent, so
    # garbage rows in a partial tail tile never contaminate valid rows.
    m = jnp.max(logits, axis=1, keepdims=True)
    shifted = logits - m
    lse = jnp.log(jnp.sum(jnp.exp(shifted), axis=1, keepdims=True))
    out_ref[...] = shifted - lse


# ----------------------------------------------------------------------------
# Parameter construction (static setup glue, plain JAX).
# ----------------------------------------------------------------------------

def ep_mask(scores, k):
    """Edge-popup mask: keep top-k fraction of |scores|, zero the rest.

    Matches GetSubnet 'ep': lowest int((1-k)*numel) entries -> 0, rest -> 1.
    """
    flat = jnp.abs(scores).ravel()
    j = int((1.0 - k) * flat.size)
    idx = jnp.argsort(flat)
    out = jnp.zeros_like(flat).at[idx[j:]].set(1.0)
    return out.reshape(scores.shape)


def signed_constant_weight(key, out_f, in_f):
    """SupermaskLinear weight init: sign(kaiming_uniform) * (gain/sqrt(fan_in))."""
    gain = math.sqrt(2.0)                              # relu gain
    std = gain / math.sqrt(in_f)                       # fan_in mode
    bound = math.sqrt(3.0) * (1.0 / math.sqrt(in_f))   # only the sign matters
    w = jax.random.uniform(key, (out_f, in_f), jnp.float32, -bound, bound)
    return jnp.sign(w) * std


def make_params(key):
    ks = jax.random.split(key, 8)
    h = NUM_NEURON
    # fc1
    w1 = signed_constant_weight(ks[0], h, IN_FEATURES)                 # (20, 784)
    s1 = jax.random.uniform(ks[1], (h, IN_FEATURES), jnp.float32,
                            -math.sqrt(3.0 / IN_FEATURES),
                            math.sqrt(3.0 / IN_FEATURES))
    b1 = jax.random.uniform(ks[2], (1, h), jnp.float32,
                            -1.0 / math.sqrt(IN_FEATURES),
                            1.0 / math.sqrt(IN_FEATURES))
    bs1 = jax.random.uniform(ks[3], (1, h), jnp.float32, -1.0, 1.0)
    # fc2
    w2 = signed_constant_weight(ks[4], OUT_FEATURES, h)                # (10, 20)
    s2 = jax.random.uniform(ks[5], (OUT_FEATURES, h), jnp.float32,
                            -math.sqrt(3.0 / h), math.sqrt(3.0 / h))
    b2 = jax.random.uniform(ks[6], (1, OUT_FEATURES), jnp.float32,
                            -1.0 / math.sqrt(h), 1.0 / math.sqrt(h))
    bs2 = jax.random.uniform(ks[7], (1, OUT_FEATURES), jnp.float32, -1.0, 1.0)

    m1 = ep_mask(s1, SPARSITY)
    bm1 = ep_mask(bs1, SPARSITY) if USE_BIAS else jnp.ones_like(b1)
    m2 = ep_mask(s2, SPARSITY)
    bm2 = ep_mask(bs2, SPARSITY) if USE_BIAS else jnp.ones_like(b2)

    return dict(w1=w1, m1=m1, b1=b1, bm1=bm1,
                w2=w2, m2=m2, b2=b2, bm2=bm2)


def fold_params(params):
    """One-time precompute: fold masks in, transpose to (in, out), cast.

    w1 is the only weight with meaningful size; it stays VMEM-resident as bf16.
    The tiny fc2 weight and both biases stay f32 so all post-matmul math runs
    in f32 (v5e VPU/EUP have no bf16 path).
    """
    w1 = (params["w1"] * params["m1"]).T.astype(jnp.bfloat16)   # (784, 20)
    b1 = (params["b1"] * params["bm1"]).astype(jnp.float32)     # (1, 20)
    w2 = (params["w2"] * params["m2"]).T.astype(jnp.float32)    # (20, 10)
    b2 = (params["b2"] * params["bm2"]).astype(jnp.float32)     # (1, 10)
    return dict(w1=w1, b1=b1, w2=w2, b2=b2)


# ----------------------------------------------------------------------------
# Pallas wrapper.
# ----------------------------------------------------------------------------

def _round_up(x, m):
    return ((x + m - 1) // m) * m


def _choose_bt(B, max_bt):
    """Pick the batch tile.

    * multiple of 8 (sublane) unless it equals B (full-dim blocks are allowed),
    * capped so the f32 x tile (x2 pipeline buffers) fits the VMEM budget,
    * for large batches, aim for >= 2 grid steps so v7x's two TensorCores both
      get work (the batch axis is marked "parallel").
    """
    if B <= max_bt:
        if B >= 2048:
            bt = min(max_bt, _round_up(pl.cdiv(B, 2), 8))
            return bt if bt < B else B
        return B                      # small batch: one tile, full-dim block
    return max_bt


def net1_forward(x_nchw, folded, *, max_bt=MAX_BATCH_TILE):
    B = x_nchw.shape[0]
    x2d = x_nchw.reshape(B, -1)                                  # (B, 784) f32 view
    assert x2d.shape[1] == IN_FEATURES

    bt = _choose_bt(B, max_bt)
    n_tiles = pl.cdiv(B, bt)
    # No jnp.pad: Pallas clips the tail block (OOB reads are garbage but the
    # compute is row-independent; OOB output rows are dropped on writeback).

    grid_spec = pltpu.PrefetchScalarGridSpec(
        num_scalar_prefetch=0,
        grid=(n_tiles,),
        in_specs=[
            # x: streamed per batch tile (double-buffered by the pipeline).
            pl.BlockSpec((bt, IN_FEATURES), lambda i: (i, 0)),
            # weights/biases: constant index_map -> stay VMEM-resident.
            pl.BlockSpec((IN_FEATURES, NUM_NEURON), lambda i: (0, 0)),
            pl.BlockSpec((1, NUM_NEURON), lambda i: (0, 0)),
            pl.BlockSpec((NUM_NEURON, OUT_FEATURES), lambda i: (0, 0)),
            pl.BlockSpec((1, OUT_FEATURES), lambda i: (0, 0)),
        ],
        out_specs=pl.BlockSpec((bt, OUT_FEATURES), lambda i: (i, 0)),
    )

    cost = pl.CostEstimate(
        flops=2 * B * IN_FEATURES * NUM_NEURON + 2 * B * NUM_NEURON * OUT_FEATURES,
        transcendentals=B * (OUT_FEATURES + 1),   # exp per logit + log per row
        bytes_accessed=(B * IN_FEATURES * 4 + B * OUT_FEATURES * 4
                        + IN_FEATURES * NUM_NEURON * 2
                        + NUM_NEURON * OUT_FEATURES * 4
                        + (NUM_NEURON + OUT_FEATURES) * 4),
    )

    out = pl.pallas_call(
        net1_kernel,
        out_shape=jax.ShapeDtypeStruct((B, OUT_FEATURES), jnp.float32),
        grid_spec=grid_spec,
        compiler_params=pltpu.CompilerParams(
            dimension_semantics=("parallel",),
            vmem_limit_bytes=VMEM_LIMIT_BYTES,
        ),
        cost_estimate=cost,
    )(x2d, folded["w1"], folded["b1"], folded["w2"], folded["b2"])
    return out


# ----------------------------------------------------------------------------
# References.
# ----------------------------------------------------------------------------

def net1_reference_bf16(x_nchw, folded):
    """Plain-JAX reference matching the kernel's exact numerics (bf16 fc1)."""
    B = x_nchw.shape[0]
    x = x_nchw.reshape(B, -1).astype(jnp.bfloat16)
    h = jnp.dot(x, folded["w1"], preferred_element_type=jnp.float32)
    h = jnp.maximum(h + folded["b1"], 0.0)
    logits = jnp.dot(h, folded["w2"], preferred_element_type=jnp.float32)
    logits = logits + folded["b2"]
    return jax.nn.log_softmax(logits, axis=1)


def net1_reference_f32(x_nchw, params):
    """Full-f32 reference of the original module semantics."""
    B = x_nchw.shape[0]
    x = x_nchw.reshape(B, -1).astype(jnp.float32)
    w1 = params["w1"] * params["m1"]
    b1 = (params["b1"] * params["bm1"])[0]
    h = jnp.maximum(x @ w1.T + b1, 0.0)
    w2 = params["w2"] * params["m2"]
    b2 = (params["b2"] * params["bm2"])[0]
    logits = h @ w2.T + b2
    return jax.nn.log_softmax(logits, axis=1)


if __name__ == "__main__":
    key = jax.random.PRNGKey(0)
    k_x, k_p = jax.random.split(key)

    # Input in PyTorch NCHW convention: (batch=2, channels=1, 28, 28).
    x = jax.random.normal(k_x, (2, 1, 28, 28), dtype=jnp.float32)
    params = make_params(k_p)
    folded = fold_params(params)      # one-time mask folding / transpose / cast

    out = net1_forward(x, folded)
    out = jax.block_until_ready(out)
    assert out.shape == (2, OUT_FEATURES)

    # Tight check vs a reference using the identical bf16-fc1 numerics.
    ref_bf16 = net1_reference_bf16(x, folded)
    assert jnp.allclose(out, ref_bf16, atol=1e-3, rtol=1e-3), \
        "mismatch vs bf16-matched reference"

    # Loose check vs the full-f32 module semantics (bf16 fc1 precision).
    ref_f32 = net1_reference_f32(x, params)
    assert jnp.allclose(out, ref_f32, atol=5e-2, rtol=5e-2), \
        "mismatch vs f32 reference"

    print("KERNEL_OK")
</pallas_src>

<mosaic_0001>
module attributes {stable_mosaic.version = 11 : i64} {
  func.func @net1_kernel(%arg0: i32, %arg1: memref<2x784xf32, #tpu.memory_space<vmem>>, %arg2: memref<784x20xbf16, #tpu.memory_space<vmem>>, %arg3: memref<1x20xf32, #tpu.memory_space<vmem>>, %arg4: memref<20x10xf32, #tpu.memory_space<vmem>>, %arg5: memref<1x10xf32, #tpu.memory_space<vmem>>, %arg6: memref<2x10xf32, #tpu.memory_space<vmem>>) attributes {dimension_semantics = [#tpu.dimension_semantics<parallel>], iteration_bounds = array<i64: 1>, scalar_prefetch = 0 : i64, scratch_operands = 0 : i64, tpu.core_type = #tpu.core_type<tc>, window_params = [{transform_indices = @transform_0, window_bounds = array<i64: 2, 784>}, {pipeline_mode = #tpu.pipeline_mode<synchronous>, transform_indices = @transform_1, window_bounds = array<i64: 784, 20>}, {pipeline_mode = #tpu.pipeline_mode<synchronous>, transform_indices = @transform_2, window_bounds = array<i64: 1, 20>}, {pipeline_mode = #tpu.pipeline_mode<synchronous>, transform_indices = @transform_3, window_bounds = array<i64: 20, 10>}, {pipeline_mode = #tpu.pipeline_mode<synchronous>, transform_indices = @transform_4, window_bounds = array<i64: 1, 10>}, {transform_indices = @transform_5, window_bounds = array<i64: 2, 10>}]} {
    %c0 = arith.constant 0 : index
    %c0_0 = arith.constant 0 : index
    %0 = vector.load %arg1[%c0, %c0_0] : memref<2x784xf32, #tpu.memory_space<vmem>>, vector<2x784xf32>
    %1 = arith.truncf %0 : vector<2x784xf32> to vector<2x784xbf16>
    %c0_1 = arith.constant 0 : index
    %c0_2 = arith.constant 0 : index
    %2 = vector.load %arg2[%c0_1, %c0_2] : memref<784x20xbf16, #tpu.memory_space<vmem>>, vector<784x20xbf16>
    %cst = arith.constant dense<0.000000e+00> : vector<2x20xf32>
    %3 = tpu.matmul %1, %2, %cst {dimension_numbers = #tpu.dot_dimension_numbers<[1], [0], [0], [1], [0, 0, 1, 1], [], []>} : vector<2x784xbf16>, vector<784x20xbf16>, vector<2x20xf32> -> vector<2x20xf32>
    %c0_3 = arith.constant 0 : index
    %c0_4 = arith.constant 0 : index
    %4 = vector.load %arg3[%c0_3, %c0_4] : memref<1x20xf32, #tpu.memory_space<vmem>>, vector<1x20xf32>
    %5 = vector.broadcast %4 : vector<1x20xf32> to vector<2x20xf32>
    %6 = arith.addf %3, %5 : vector<2x20xf32>
    %cst_5 = arith.constant 0.000000e+00 : f32
    %7 = vector.broadcast %cst_5 : f32 to vector<2x20xf32>
    %8 = arith.maximumf %6, %7 : vector<2x20xf32>
    %c0_6 = arith.constant 0 : index
    %c0_7 = arith.constant 0 : index
    %9 = vector.load %arg4[%c0_6, %c0_7] : memref<20x10xf32, #tpu.memory_space<vmem>>, vector<20x10xf32>
    %cst_8 = arith.constant dense<0.000000e+00> : vector<2x10xf32>
    %10 = tpu.matmul %8, %9, %cst_8 {dimension_numbers = #tpu.dot_dimension_numbers<[1], [0], [0], [1], [0, 0, 1, 1], [], []>} : vector<2x20xf32>, vector<20x10xf32>, vector<2x10xf32> -> vector<2x10xf32>
    %c0_9 = arith.constant 0 : index
    %c0_10 = arith.constant 0 : index
    %11 = vector.load %arg5[%c0_9, %c0_10] : memref<1x10xf32, #tpu.memory_space<vmem>>, vector<1x10xf32>
    %12 = vector.broadcast %11 : vector<1x10xf32> to vector<2x10xf32>
    %13 = arith.addf %10, %12 : vector<2x10xf32>
    %cst_11 = arith.constant dense<0xFF800000> : vector<2xf32>
    %14 = vector.multi_reduction <maximumf>, %13, %cst_11 [1] : vector<2x10xf32> to vector<2xf32>
    %15 = vector.shape_cast %14 : vector<2xf32> to vector<2x1xf32>
    %16 = vector.broadcast %15 : vector<2x1xf32> to vector<2x10xf32>
    %17 = arith.subf %13, %16 : vector<2x10xf32>
    %18 = math.exp %17 : vector<2x10xf32>
    %cst_12 = arith.constant dense<0.000000e+00> : vector<2xf32>
    %19 = vector.multi_reduction <add>, %18, %cst_12 [1] : vector<2x10xf32> to vector<2xf32>
    %20 = vector.shape_cast %19 : vector<2xf32> to vector<2x1xf32>
    %21 = math.log %20 : vector<2x1xf32>
    %22 = vector.broadcast %21 : vector<2x1xf32> to vector<2x10xf32>
    %23 = arith.subf %17, %22 : vector<2x10xf32>
    %c0_13 = arith.constant 0 : index
    %c0_14 = arith.constant 0 : index
    %24 = vector.load %arg6[%c0_13, %c0_14] : memref<2x10xf32, #tpu.memory_space<vmem>>, vector<2x10xf32>
    tpu.vector_store %arg6[%c0_13, %c0_14], %23 {strides = array<i32>} : memref<2x10xf32, #tpu.memory_space<vmem>>, vector<2x10xf32>,
    return
  }
  func.func @transform_0(%arg0: i32) -> (i32, i32) {
    %c0_i32 = arith.constant 0 : i32
    %c0_i32_0 = arith.constant 0 : i32
    return %arg0, %c0_i32 : i32, i32
  }
  func.func @transform_1(%arg0: i32) -> (i32, i32) {
    %c0_i32 = arith.constant 0 : i32
    %c0_i32_0 = arith.constant 0 : i32
    %c0_i32_1 = arith.constant 0 : i32
    return %c0_i32, %c0_i32_0 : i32, i32
  }
  func.func @transform_2(%arg0: i32) -> (i32, i32) {
    %c0_i32 = arith.constant 0 : i32
    %c0_i32_0 = arith.constant 0 : i32
    %c0_i32_1 = arith.constant 0 : i32
    return %c0_i32, %c0_i32_0 : i32, i32
  }
  func.func @transform_3(%arg0: i32) -> (i32, i32) {
    %c0_i32 = arith.constant 0 : i32
    %c0_i32_0 = arith.constant 0 : i32
    %c0_i32_1 = arith.constant 0 : i32
    return %c0_i32, %c0_i32_0 : i32, i32
  }
  func.func @transform_4(%arg0: i32) -> (i32, i32) {
    %c0_i32 = arith.constant 0 : i32
    %c0_i32_0 = arith.constant 0 : i32
    %c0_i32_1 = arith.constant 0 : i32
    return %c0_i32, %c0_i32_0 : i32, i32
  }
  func.func @transform_5(%arg0: i32) -> (i32, i32) {
    %c0_i32 = arith.constant 0 : i32
    %c0_i32_0 = arith.constant 0 : i32
    return %arg0, %c0_i32 : i32, i32
  }
}

</mosaic_0001>

<bundles_post_ra>
// kernel: tpu_custom_call.1
= control target key start
LH: loop header
LB: loop body
LE: loop exit
PB: predicated region body
PF: predicated region fallthrough
CT: control target
= control target key end

     0   :  { %v30_v27 = vlaneseq  ;;  %v981_v35 = vmov 1983009808   ;;  %v982_v40 = vmov 0.0   ;;  %vm983_vm0 = vmmov 0   ;;  %s1205_s0 = inlined_call_operand.vmem [shape: f32[2,784], index: 0, kind: input, shape index: {}]   ;;  %s1206_s1 = inlined_call_operand.vmem [shape: bf16[784,20], index: 1, kind: input, shape index: {}]   ;;  %s1207_s2 = inlined_call_operand.vmem [shape: f32[1,20], index: 2, kind: input, shape index: {}]   ;;  %s1208_s3 = inlined_call_operand.vmem [shape: f32[20,10], index: 3, kind: input, shape index: {}]   ;;  %s1209_s4 = inlined_call_operand.vmem [shape: f32[1,10], index: 4, kind: input, shape index: {}]   ;;  %s1210_s5 = inlined_call_operand.hbm [shape: f32[2,10], index: 5, kind: output, shape index: {}]  }
   0x1   :  { %v902_v0 = vld [vmem:[%s1206_s1 + $0x40] sm:$0xff]   ;;  %v906_v4 = vld [vmem:[%s1206_s1 + $0x48] sm:$0xff]   ;;  %v910_v8 = vld [vmem:[%s1206_s1 + $0x50] sm:$0xff]   ;;  %v28_v36 = vunpack.c.l.s4 %v981_v35 }
   0x2   :  { %v903_v1 = vld [vmem:[%s1206_s1] sm:$0xff]   ;;  %807 = vmatprep.subr.bf16.mxu0 %v902_v0  ;;  %v907_v5 = vld [vmem:[%s1206_s1 + $0x8] sm:$0xff]   ;;  %v911_v9 = vld [vmem:[%s1206_s1 + $0x10] sm:$0xff]   ;;  %v31_v32 = vshrl.u32 %v30_v27, 7 }
   0x3   :  { %v904_v2 = vld [vmem:[%s1206_s1 + $0xc0] sm:$0xff]   ;;  %808 = vmatpush3.bf16.msra.mxu0 %v903_v1  ;;  %v908_v6 = vld [vmem:[%s1206_s1 + $0xc8] sm:$0xff]   ;;  %v912_v10 = vld [vmem:[%s1206_s1 + $0xd0] sm:$0xff]   ;;  %v29_v38 = vunpack.c.0.s8 %v28_v36 }
   0x4   :  { %v905_v3 = vld [vmem:[%s1206_s1 + $0x80] sm:$0xff]   ;;  %829 = vmatprep.subr.bf16.mxu1 %v904_v2  ;;  %809 = vmatprep.subr.bf16.mxu0 %v906_v4  ;;  %v909_v7 = vld [vmem:[%s1206_s1 + $0x88] sm:$0xff]   ;;  %v913_v11 = vld [vmem:[%s1206_s1 + $0x90] sm:$0xff]  }
   0x5   :  { %830 = vmatpush3.bf16.msra.mxu1 %v905_v3  ;;  %v914_v12 = vld [vmem:[%s1206_s1 + $0x58] sm:$0xff]   ;;  %v918_v16 = vld [vmem:[%s1206_s1 + $0x60] sm:$0xff]   ;;  %v922_v20 = vld [vmem:[%s1206_s1 + $0x68] sm:$0xff]   ;;  %v32_v41 = vsub.s32 %v29_v38, %v31_v32 }
   0x6   :  { %831 = vmatprep.subr.bf16.mxu1 %v908_v6  ;;  %v915_v13 = vld [vmem:[%s1206_s1 + $0x18] sm:$0xff]   ;;  %v919_v17 = vld [vmem:[%s1206_s1 + $0x20] sm:$0xff]   ;;  %v923_v21 = vld [vmem:[%s1206_s1 + $0x28] sm:$0xff]  }
   0x7   :  { %810 = vmatpush3.bf16.msra.mxu0 %v907_v5  ;;  %v916_v14 = vld [vmem:[%s1206_s1 + $0xd8] sm:$0xff]   ;;  %v920_v18 = vld [vmem:[%s1206_s1 + $0xe0] sm:$0xff]   ;;  %v924_v22 = vld [vmem:[%s1206_s1 + $0xe8] sm:$0xff]  }
   0x8   :  { %811 = vmatprep.subr.bf16.mxu0 %v910_v8  ;;  %v917_v15 = vld [vmem:[%s1206_s1 + $0x98] sm:$0xff]   ;;  %v921_v19 = vld [vmem:[%s1206_s1 + $0xa0] sm:$0xff]   ;;  %v925_v23 = vld [vmem:[%s1206_s1 + $0xa8] sm:$0xff]  }
   0x9   :  { %832 = vmatpush3.bf16.msra.mxu1 %v909_v7  ;;  %v926_v24 = vld [vmem:[%s1206_s1 + $0x70] sm:$0xff]   ;;  %v930_v29 = vld [vmem:[%s1206_s1 + $0x78] sm:$0xff]   ;;  %v22_v33 = vld [vmem:[%s1205_s0] sm:$0xff] }
   0xa   :  { %833 = vmatprep.subr.bf16.mxu1 %v912_v10  ;;  %v927_v25 = vld [vmem:[%s1206_s1 + $0x30] sm:$0xff]   ;;  %v931_v30 = vld [vmem:[%s1206_s1 + $0x38] sm:$0xff]   ;;  %v934_v37 = vld [vmem:[%s1206_s1 + $0x140] sm:$0xff]   ;;  %v26_v39 = vcombine.high %v22_v33, %v22_v33  ;;  %v33_v42 = vrot.slane %v22_v33, %v32_v41 }
   0xb   :  { %812 = vmatpush3.bf16.msra.mxu0 %v911_v9  ;;  %v928_v26 = vld [vmem:[%s1206_s1 + $0xf0] sm:$0xff]   ;;  %v932_v31 = vld [vmem:[%s1206_s1 + $0xf8] sm:$0xff]   ;;  %v936_v50 = vld [vmem:[%s1206_s1 + $0x100] sm:$0xff]  }
   0xc   :  { %813 = vmatprep.subr.bf16.mxu0 %v914_v12  ;;  %v929_v28 = vld [vmem:[%s1206_s1 + $0xb0] sm:$0xff]   ;;  %v933_v34 = vld [vmem:[%s1206_s1 + $0xb8] sm:$0xff]   ;;  %v40_v43 = vrot.slane %v26_v39, %v32_v41  ;;  %v41_v44 = vcombine.high %v33_v42, %v33_v42  ;;  %v66_v46 = vpack.c.bf16 %v33_v42, %v33_v42  ;;  %v937_v51 = vld [vmem:[%s1206_s1 + $0x148] sm:$0xff]  }
   0xd   :  { %834 = vmatpush3.bf16.msra.mxu1 %v913_v11  ;;  %v938_v52 = vld [vmem:[%s1206_s1 + $0x108] sm:$0xff]   ;;  %v939_v53 = vld [vmem:[%s1206_s1 + $0x150] sm:$0xff]   ;;  %v951_v54 = vld [vmem:[%s1206_s1 + $0x180] sm:$0xff]  }
   0xe   :  { %835 = vmatprep.subr.bf16.mxu1 %v916_v14  ;;  %v42_v45 = vcombine.high %v40_v43, %v40_v43  ;;  %v68_v47 = vpack.c.bf16 %v40_v43, %v40_v43  ;;  %v67_v48 = vpack.c.bf16 %v41_v44, %v41_v44  ;;  %v23_v55 = vld [vmem:[%s1205_s0 + $0x8] sm:$0x3f] }
   0xf   :  { %814 = vmatpush3.bf16.msra.mxu0 %v915_v13 }
  0x10   :  { %815 = vmatprep.subr.bf16.mxu0 %v918_v16  ;;  %v69_v49 = vpack.c.bf16 %v42_v45, %v42_v45  ;;  %508 = vmatprep.mubr.bf16.mxu0 %v67_v48 }
  0x11   :  { %836 = vmatpush3.bf16.msra.mxu1 %v917_v15 }
  0x12   :  { %837 = vmatprep.subr.bf16.mxu1 %v920_v18  ;;  %548 = vmatprep.mubr.bf16.mxu1 %v69_v49 }
  0x13   :  { %816 = vmatpush3.bf16.msra.mxu0 %v919_v17 }
  0x14   :  { %817 = vmatprep.subr.bf16.mxu0 %v922_v20 }
  0x15   :  { %838 = vmatpush3.bf16.msra.mxu1 %v921_v19 }
  0x16   :  { %839 = vmatprep.subr.bf16.mxu1 %v924_v22 }
  0x17   :  { %818 = vmatpush3.bf16.msra.mxu0 %v923_v21 }
  0x18   :  { %819 = vmatprep.subr.bf16.mxu0 %v926_v24 }
  0x19   :  { %840 = vmatpush3.bf16.msra.mxu1 %v925_v23 }
  0x1a   :  { %841 = vmatprep.subr.bf16.mxu1 %v928_v26 }
  0x1b   :  { %820 = vmatpush3.bf16.msra.mxu0 %v927_v25 }
  0x1c   :  { %821 = vmatprep.subr.bf16.mxu0 %v930_v29 }
  0x1d   :  { %842 = vmatpush3.bf16.msra.mxu1 %v929_v28 }
  0x1e   :  { %843 = vmatprep.subr.bf16.mxu1 %v932_v31 }
  0x1f   :  { %822 = vmatpush3.bf16.msra.mxu0 %v931_v30 }
  0x20   :  { %851 = vmatprep.subr.bf16.mxu0 %v934_v37 }
  0x21   :  { %844 = vmatpush3.bf16.msra.mxu1 %v933_v34 }
  0x22   :  { %879 = vmatprep.subr.bf16.mxu1 %v982_v40  ;;  %509 = vmatmul.mubr.bf16.vlgmr.msra.gmra.mrb[0].mxu0 %v66_v46 }
  0x23   :  { %852 = vmatpush3.bf16.msra.mxu0 %v936_v50 }
  0x24   :  { %549 = vmatmul.mubr.bf16.vlgmr.msra.gmra.mrb[0].mxu1 %v68_v47  ;;  %853 = vmatprep.subr.bf16.mxu0 %v937_v51 }
  0x25   :  { %881 = vmatprep.mubr.msk.bf16.mxu1 %vm983_vm0, %v982_v40 }
  0x26   :  { %10 = vsyncpa [#allocation3], 0  ;;  %v940_v56 = vld [vmem:[%s1206_s1 + $0x110] sm:$0xff]   ;;  %v43_v57 = vcombine.high %v23_v55, %v23_v55  ;;  %v50_v58 = vrot.slane %v23_v55, %v32_v41  ;;  %v941_v59 = vld [vmem:[%s1206_s1 + $0x158] sm:$0xff]   ;;  %880 = vmatpush3.bf16.msra.mxu1 %v951_v54  ;;  %vm472_vm1 = vcmask 130048   ;;  %v984_v12 = vmov 0.0|0.0  }
  0x27   :  { %854 = vmatpush3.bf16.msra.mxu0 %v938_v52  ;;  %v942_v62 = vld [vmem:[%s1206_s1 + $0x118] sm:$0xff]   ;;  %v943_v1 = vld [vmem:[%s1206_s1 + $0x160] sm:$0xff]   ;;  %v945_v3 = vld [vmem:[%s1206_s1 + $0x168] sm:$0xff]   ;;  %894 = vmatprep.subr.bf16.mxu1 %v984_v12  ;;  %vm651_vm2 = vcmask 1043456   ;;  %vm647_vm3 = vcmask 162816   ;;  %vm725_vm4 = vcmask 74752  }
  0x28   :  { %855 = vmatprep.subr.bf16.mxu0 %v939_v53  ;;  %v57_v60 = vrot.slane %v43_v57, %v32_v41  ;;  %v58_v61 = vcombine.high %v50_v58, %v50_v58  ;;  %v944_v2 = vld [vmem:[%s1206_s1 + $0x120] sm:$0xff]   ;;  %v946_v4 = vld [vmem:[%s1206_s1 + $0x128] sm:$0xff]   ;;  %v947_v5 = vld [vmem:[%s1206_s1 + $0x170] sm:$0xff]   ;;  %v70_v9 = vpack.c.bf16 %v50_v58, %v50_v58  ;;  %s985_s26 = smov [#allocation2]  }
  0x29   :  { %v948_v6 = vld [vmem:[%s1206_s1 + $0x130] sm:$0xff]   ;;  %v949_v7 = vld [vmem:[%s1206_s1 + $0x178] sm:$0xff]   ;;  %v637_v10 = vld [vmem:[%s1208_s3] sm:$0xff] }
  0x2a   :  { %v71_v63 = vpack.c.bf16 %v58_v61, %v58_v61  ;;  %v72_v0 = vpack.c.bf16 %v57_v60, %v57_v60  ;;  %v950_v8 = vld [vmem:[%s1206_s1 + $0x138] sm:$0xff]   ;;  %v638_v11 = vld [vmem:[%s1208_s3 + $0x8] sm:$0xff]  ;;  %v639_v14 = vld [vmem:[%s1208_s3 + $0x10] sm:$0xf] }
  0x2b   :  { %856 = vmatpush3.bf16.msra.mxu0 %v940_v56  ;;  %v895_v13 = vpack.c.bf16 %v638_v11, %v637_v10  ;;  %v753_v17 = vld [vmem:[%s1207_s2] ss:$0 sm:$0xff] }
  0x2c   :  { %857 = vmatprep.subr.bf16.mxu0 %v941_v59  ;;  %588 = vmatprep.mubr.bf16.mxu0 %v71_v63 }
  0x2d   :  { %882 = vmatmul.mubr.msk.bf16.vlgmr.msra.gmra.mrb[4].mxu1 %vm472_vm1, %v72_v0 }
  0x2e   :  { %891 = vmatprep.mubr.msk.f32.mxu1 %vm983_vm0, %v982_v40  ;;  %896 = vmatpush3.bf16.msra.mxu1 %v895_v13 }
  0x2f   :  { %858 = vmatpush3.bf16.msra.mxu0 %v942_v62  ;;  %889 = vmatprep.subr.mxu1 %v982_v40  ;;  %v804_v40 = vld [vmem:[%s1209_s4] ss:$0 sm:$0xff]  ;;  %s745_s4 = sshll.u32 %s985_s26, 4  ;;  %s746_s4 = int_to_ptr.vmem [resolvable:$true] %s745_s4 }
  0x30   :  { %859 = vmatprep.subr.bf16.mxu0 %v943_v1  ;;  %s957_s27 = scalar_lea.vmem %s746_s4, 32  ;;  %p962_p1 = scmp.lt.s32.totalorder %s746_s4, %s746_s4 }
  0x31   :  { %p958_p0 = scmp.ne.s32.totalorder %s746_s4, %s957_s27  ;;  %p963_p2 = scmp.lt.s32.totalorder %s957_s27, %s957_s27 }
  0x32   :  { %890 = vmatpush3.msk.msra.mxu1 %vm651_vm2, %v639_v14 }
  0x33   :  { %860 = vmatpush3.bf16.msra.mxu0 %v944_v2  ;;  %p964_p3 = por %p963_p2, %p962_p1 }
  0x34   :  { %861 = vmatprep.subr.bf16.mxu0 %v945_v3 }
  0x35   :  { %p965_p4 = pnand %p964_p3, %p958_p0 }
  0x37   :  { %862 = vmatpush3.bf16.msra.mxu0 %v946_v4 }
  0x38   :  { %863 = vmatprep.subr.bf16.mxu0 %v947_v5 }
  0x3b   :  { %864 = vmatpush3.bf16.msra.mxu0 %v948_v6 }
  0x3c   :  { %865 = vmatprep.subr.bf16.mxu0 %v949_v7 }
  0x3f   :  { %866 = vmatpush3.bf16.msra.mxu0 %v950_v8 }
  0x42   :  { %589 = vmatmul.mubr.bf16.vlgmr.msra.gmra.mrb[4].mxu0 %v70_v9 }
  0xf5   :  { %v823_v15 = vpop.f32.mrb[0].mxu0 }
  0xf6   :  { %v824_v18 = vpop.f32.mrb[1].mxu0 }
  0xf7   :  { %v845_v16 = vpop.f32.mrb[0].mxu1  ;;  %v825_v20 = vadd.f32 %v824_v18, %v823_v15  ;;  %v826_v21 = vpop.f32.mrb[2].mxu0 }
  0xf8   :  { %v846_v19 = vpop.f32.mrb[1].mxu1  ;;  %v827_v24 = vpop.f32.mrb[3].mxu0 }
  0xf9   :  { %v847_v22 = vadd.f32 %v846_v19, %v845_v16  ;;  %v848_v23 = vpop.f32.mrb[2].mxu1  ;;  %v511_v26 = vadd.f32 %v825_v20, %v753_v17 }
  0xfa   :  { %v849_v25 = vpop.f32.mrb[3].mxu1 }
  0xfb   :  { %v551_v27 = vadd.f32 %v847_v22, %v511_v26 }
 0x100   :  { %v630_v28 = vpop.f32.mrb[4].mxu1 }
 0x101   :  { %v883_v29 = vpop.f32.mrb[5].mxu1 }
 0x102   :  { %v633_v30 = vpop.f32.mrb[6].mxu1 }
 0x103   :  { %v884_v31 = vpop.f32.mrb[7].mxu1 }
 0x115   :  { %v867_v32 = vpop.f32.mrb[4].mxu0 }
 0x116   :  { %v868_v33 = vpop.f32.mrb[5].mxu0 }
 0x117   :  { %v869_v34 = vadd.f32 %v868_v33, %v867_v32  ;;  %v870_v35 = vpop.f32.mrb[6].mxu0 }
 0x118   :  { %v871_v36 = vpop.f32.mrb[7].mxu0 }
 0x119   :  { %v591_v37 = vadd.f32 %v869_v34, %v551_v27 }
 0x11b   :  { %v631_v38 = vadd.f32 %v630_v28, %v591_v37 }
 0x11d   :  { %v636_v39 = vmax.f32 %v631_v38, 0.0 }
 0x11f   :  { %892 = vmatmul.mubr.msk.f32.vlgmr.msra.gmra.mrb[8].mxu1 %vm647_vm3, %v636_v39 }
 0x1f2   :  { %v721_v41 = vpop.f32.mrb[8].mxu1 }
 0x1f3   :  { %v722_v42 = vadd.f32 %v804_v40, %v721_v41  ;;  %v893_v43 = vpop.f32.mrb[9].mxu1 }
 0x1f5   :  { %v726_v44 = vsel %vm725_vm4, %v722_v42, -inf }
 0x1f6   :  { %727 = vmax.xlane.f32.xlu0 %v726_v44 }
 0x283   :  { %v728_v45 = vpop.xlane.xlu0 %727 }
 0x284   :  { %v729_v46 = vsub.f32 %v722_v42, %v728_v45 }
 0x286   :  { %v730_v47 = vmul.f32 1.442695, %v729_v46 }
 0x288   :  { %953 = vpow2.f32 %v730_v47 }
 0x292   :  { %v954_v48 = vpop.eup %953 }
 0x293   :  { %v732_v49 = vsel %vm725_vm4, %v954_v48, 0.0 }
 0x294   :  { %733 = vadd.xlane.f32.xlu0 %v732_v49 }
 0x321   :  { %v734_v50 = vpop.xlane.xlu0 %733 }
 0x322   :  { %955 = vlog2.f32 %v734_v50 }
 0x32c   :  { %v956_v51 = vpop.eup %955 }
 0x32d   :  { %v736_v52 = vmul.f32 0.6931472, %v956_v51 }
 0x32f   :  { %v737_v53 = vsub.f32 %v729_v46, %v736_v52 }
 0x331   :  { %738 = vst.msk [vmem:[#allocation2] sm:$0x3] %vm725_vm4, %v737_v53 }
 0x332   :  { %968 = shalt.err (!%p965_p4)
}
 0x333   :  { %s969_s29 = scalar_lea.hbm %s1210_s5, 32 }
 0x334   :  { %p970_p5 = scmp.ne.s32.totalorder %s1210_s5, %s969_s29  ;;  %p973_p6 = scmp.lt.u32.totalorder %s969_s29, %s1210_s5 }
 0x336   :  { %p975_p7 = pnand %p973_p6, %p970_p5 }
 0x338   :  { %978 = shalt.err (!%p975_p7)
}
 0x339   :  { %748 = dma.vmem_to_hbm [thread:$0]  %s746_s4, 32, %s1210_s5, [#allocation3]  }
 0x33a   :  { %979 = dma.done.wait [#allocation3], 32  }
 0x33b   :  { %980 = vsyncadd [#allocation3], 4294967264 }
 0x33c   :  { %752 = vsyncpa [#allocation3], 1 }

</bundles_post_ra>
